<compile_context>
chip_gen: v7x
topology: tpu7x:2x2x1
jax: 0.10.0
libtpu: 0.0.40
codegen_flags: <defaults>
</compile_context>

<pallas_src>
import jax
import jax.numpy as jnp
from jax.experimental import pallas as pl
from jax.experimental.pallas import tpu as pltpu


# ---------------------------------------------------------------------------
# Kernel
# ---------------------------------------------------------------------------
def _output_network_kernel(x_ref, w_even_ref, w_odd_ref, b_even_ref, b_odd_ref,
                           w_voc_ref, b_voc_ref, out_ref):
    """One vocab tile: fused projections -> maxout -> [B, TILE_V] logits.

    The maxout pre-activation is recomputed per vocab tile; its inputs keep the
    same block index across the grid (so Pallas does not re-DMA them) and its
    FLOPs are negligible next to streaming the [M, TILE_V] vocab-weight tile.
    Recomputing (instead of a pl.when-guarded scratch) keeps the vocab axis
    safely "parallel" for megacore splitting on v7x.
    """
    # t_even / t_odd: [B, M], f32 accumulation on the MXU, lane-aligned halves.
    t_even = jnp.dot(x_ref[...], w_even_ref[...],
                     preferred_element_type=jnp.float32) + b_even_ref[...]
    t_odd = jnp.dot(x_ref[...], w_odd_ref[...],
                    preferred_element_type=jnp.float32) + b_odd_ref[...]
    # maxout over (even, odd) pairs -> pure VPU elementwise max.
    t = jnp.maximum(t_even, t_odd).astype(w_voc_ref.dtype)
    # vocab tile projection: [B, M] x [M, TILE_V] -> [B, TILE_V]
    logits = jnp.dot(t, w_voc_ref[...],
                     preferred_element_type=jnp.float32) + b_voc_ref[...]
    out_ref[...] = logits.astype(out_ref.dtype)


# ---------------------------------------------------------------------------
# One-time weight preparation (hoist out of the per-token decode loop)
# ---------------------------------------------------------------------------
def _round_up(x, m):
    return pl.cdiv(x, m) * m


def _choose_tile_v(m, v, weight_dtype, vmem_budget_bytes=8 << 20):
    """Largest multiple-of-128 vocab tile whose double-buffered weight slab
    (2 * M * tile * itemsize) stays within a conservative VMEM budget that is
    safe on v5e/v6e (32 MiB default scoped) and v7x (64 MiB physical VMEM)."""
    itemsize = jnp.dtype(weight_dtype).itemsize
    tile = (vmem_budget_bytes // (2 * max(m, 1) * itemsize)) // 128 * 128
    tile = max(128, min(int(tile), 2048))
    return int(min(tile, _round_up(v, 128)))


def prepare_output_network_params(params, *, weight_dtype=jnp.bfloat16,
                                  tile_v=None):
    """One-time prep of PyTorch-convention Linear weights:
      wu: [2M, H]  bu: [2M]   (u_o)
      wv: [2M, E]  bv: [2M]   (v_o)
      wc: [2M, 2H] bc: [2M]   (c_o)
      wo: [V,  M]  bo: [V]    (output_nn)
    """
    # Fuse the three projections into one [H+E+2H, 2M] weight (x_cat @ W + b).
    w_cat = jnp.concatenate([params["wu"], params["wv"], params["wc"]],
                            axis=1).T                         # [K, 2M]
    b_cat = (params["bu"] + params["bv"] + params["bc"]).astype(jnp.float32)

    # De-interleave maxout pairs into two lane-aligned [K, M] matrices.
    w_even = w_cat[:, 0::2].astype(weight_dtype)              # [K, M]
    w_odd = w_cat[:, 1::2].astype(weight_dtype)               # [K, M]
    b_even = b_cat[0::2][None, :]                             # [1, M] f32
    b_odd = b_cat[1::2][None, :]                              # [1, M] f32

    # Vocab projection stored as [M, V]; pad V to a multiple of the tile.
    w_voc = params["wo"].T.astype(weight_dtype)               # [M, V]
    b_voc = params["bo"].astype(jnp.float32)[None, :]         # [1, V]
    m, v = w_voc.shape
    if tile_v is None:
        tile_v = _choose_tile_v(m, v, weight_dtype)
    v_pad = _round_up(v, tile_v)
    if v_pad != v:
        w_voc = jnp.pad(w_voc, ((0, 0), (0, v_pad - v)))
        b_voc = jnp.pad(b_voc, ((0, 0), (0, v_pad - v)))

    return dict(w_even=w_even, w_odd=w_odd, b_even=b_even, b_odd=b_odd,
                w_voc=w_voc, b_voc=b_voc,
                tile_v=int(tile_v), vocab_size=int(v))


# ---------------------------------------------------------------------------
# Forward wrapper
# ---------------------------------------------------------------------------
def output_network_forward(s_i, y_i, c_i, prepped, *, out_dtype=jnp.float32):
    w_even, w_odd = prepped["w_even"], prepped["w_odd"]
    b_even, b_odd = prepped["b_even"], prepped["b_odd"]
    w_voc, b_voc = prepped["w_voc"], prepped["b_voc"]
    tile_v, vocab = prepped["tile_v"], prepped["vocab_size"]

    # Concatenate the three inputs so the fused projection is one matmul.
    x = jnp.concatenate([s_i, y_i, c_i], axis=1).astype(w_even.dtype)  # [B, K]
    b, k = x.shape
    m, v_pad = w_voc.shape
    grid = (v_pad // tile_v,)

    out = pl.pallas_call(
        _output_network_kernel,
        out_shape=jax.ShapeDtypeStruct((b, v_pad), out_dtype),
        grid=grid,
        in_specs=[
            pl.BlockSpec((b, k), lambda j: (0, 0)),       # x        (resident)
            pl.BlockSpec((k, m), lambda j: (0, 0)),       # w_even   (resident)
            pl.BlockSpec((k, m), lambda j: (0, 0)),       # w_odd    (resident)
            pl.BlockSpec((1, m), lambda j: (0, 0)),       # b_even   (resident)
            pl.BlockSpec((1, m), lambda j: (0, 0)),       # b_odd    (resident)
            pl.BlockSpec((m, tile_v), lambda j: (0, j)),  # vocab W  (streamed)
            pl.BlockSpec((1, tile_v), lambda j: (0, j)),  # vocab b  (streamed)
        ],
        out_specs=pl.BlockSpec((b, tile_v), lambda j: (0, j)),
        compiler_params=pltpu.CompilerParams(
            dimension_semantics=("parallel",)),
    )(x, w_even, w_odd, b_even, b_odd, w_voc, b_voc)

    return out[:, :vocab]


# ---------------------------------------------------------------------------
# Pure-JAX reference mirroring the PyTorch module exactly
# ---------------------------------------------------------------------------
def _reference_forward(s_i, y_i, c_i, params):
    t_tilde = (s_i @ params["wu"].T + params["bu"]
               + y_i @ params["wv"].T + params["bv"]
               + c_i @ params["wc"].T + params["bc"])
    t = jnp.maximum(t_tilde[:, 0::2], t_tilde[:, 1::2])
    return t @ params["wo"].T + params["bo"]


def _init_params(key, embedding_size, hidden_size, max_out_units, vocab_size):
    ks = jax.random.split(key, 8)
    two_m = 2 * max_out_units

    def lin(kw, kb, out_f, in_f):
        scale = 1.0 / jnp.sqrt(in_f)
        w = jax.random.uniform(kw, (out_f, in_f), jnp.float32, -scale, scale)
        b = jax.random.uniform(kb, (out_f,), jnp.float32, -scale, scale)
        return w, b

    wu, bu = lin(ks[0], ks[1], two_m, hidden_size)
    wv, bv = lin(ks[2], ks[3], two_m, embedding_size)
    wc, bc = lin(ks[4], ks[5], two_m, 2 * hidden_size)
    wo, bo = lin(ks[6], ks[7], vocab_size, max_out_units)
    return dict(wu=wu, bu=bu, wv=wv, bv=bv, wc=wc, bc=bc, wo=wo, bo=bo)


if __name__ == "__main__":
    # Small shapes consistent with the module's forward.
    B = 16                 # >= 16 so the bf16 path is sublane-tile friendly
    embedding_size = 16
    hidden_size = 32
    max_out_units = 64     # M = 64, 2M = 128 (lane-aligned)
    vocab_size = 1000      # non-multiple of 128 -> exercises pad + slice path

    key = jax.random.PRNGKey(0)
    k_s, k_y, k_c, k_p = jax.random.split(key, 4)

    s_i = jax.random.normal(k_s, (B, hidden_size), jnp.float32)
    y_i = jax.random.normal(k_y, (B, embedding_size), jnp.float32)
    c_i = jax.random.normal(k_c, (B, 2 * hidden_size), jnp.float32)
    params = _init_params(k_p, embedding_size, hidden_size,
                          max_out_units, vocab_size)

    ref = _reference_forward(s_i, y_i, c_i, params)

    # f32 path: tight semantic check vs the reference.
    prepped_f32 = prepare_output_network_params(
        params, weight_dtype=jnp.float32, tile_v=256)   # grid of 4 vocab tiles
    out_f32 = jax.block_until_ready(
        output_network_forward(s_i, y_i, c_i, prepped_f32))
    assert out_f32.shape == (B, vocab_size)
    assert jnp.allclose(out_f32, ref, atol=1e-3, rtol=1e-3), \
        "f32 mismatch vs reference"

    # bf16 fast path (recommended in production): halves HBM traffic on the
    # dominant [M, V] weight stream; f32 accumulation keeps error small.
    prepped_bf16 = prepare_output_network_params(
        params, weight_dtype=jnp.bfloat16, tile_v=256)
    out_bf16 = jax.block_until_ready(
        output_network_forward(s_i, y_i, c_i, prepped_bf16))
    assert out_bf16.shape == (B, vocab_size)
    assert jnp.allclose(out_bf16, ref, atol=5e-2, rtol=5e-2), \
        "bf16 mismatch vs reference"

    print("KERNEL_OK")
</pallas_src>

<mosaic_0001>
module attributes {stable_mosaic.version = 11 : i64} {
  func.func @_output_network_kernel(%arg0: i32, %arg1: memref<16x112xf32, #tpu.memory_space<vmem>>, %arg2: memref<112x64xf32, #tpu.memory_space<vmem>>, %arg3: memref<112x64xf32, #tpu.memory_space<vmem>>, %arg4: memref<1x64xf32, #tpu.memory_space<vmem>>, %arg5: memref<1x64xf32, #tpu.memory_space<vmem>>, %arg6: memref<64x256xf32, #tpu.memory_space<vmem>>, %arg7: memref<1x256xf32, #tpu.memory_space<vmem>>, %arg8: memref<16x256xf32, #tpu.memory_space<vmem>>) attributes {dimension_semantics = [#tpu.dimension_semantics<parallel>], iteration_bounds = array<i64: 4>, scalar_prefetch = 0 : i64, scratch_operands = 0 : i64, tpu.core_type = #tpu.core_type<tc>, window_params = [{pipeline_mode = #tpu.pipeline_mode<synchronous>, transform_indices = @transform_0, window_bounds = array<i64: 16, 112>}, {pipeline_mode = #tpu.pipeline_mode<synchronous>, transform_indices = @transform_1, window_bounds = array<i64: 112, 64>}, {pipeline_mode = #tpu.pipeline_mode<synchronous>, transform_indices = @transform_2, window_bounds = array<i64: 112, 64>}, {pipeline_mode = #tpu.pipeline_mode<synchronous>, transform_indices = @transform_3, window_bounds = array<i64: 1, 64>}, {pipeline_mode = #tpu.pipeline_mode<synchronous>, transform_indices = @transform_4, window_bounds = array<i64: 1, 64>}, {transform_indices = @transform_5, window_bounds = array<i64: 64, 256>}, {transform_indices = @transform_6, window_bounds = array<i64: 1, 256>}, {transform_indices = @transform_7, window_bounds = array<i64: 16, 256>}]} {
    %c0 = arith.constant 0 : index
    %c0_0 = arith.constant 0 : index
    %0 = vector.load %arg1[%c0, %c0_0] : memref<16x112xf32, #tpu.memory_space<vmem>>, vector<16x112xf32>
    %c0_1 = arith.constant 0 : index
    %c0_2 = arith.constant 0 : index
    %1 = vector.load %arg2[%c0_1, %c0_2] : memref<112x64xf32, #tpu.memory_space<vmem>>, vector<112x64xf32>
    %cst = arith.constant dense<0.000000e+00> : vector<16x64xf32>
    %2 = tpu.matmul %0, %1, %cst {dimension_numbers = #tpu.dot_dimension_numbers<[1], [0], [0], [1], [0, 0, 1, 1], [], []>} : vector<16x112xf32>, vector<112x64xf32>, vector<16x64xf32> -> vector<16x64xf32>
    %c0_3 = arith.constant 0 : index
    %c0_4 = arith.constant 0 : index
    %3 = vector.load %arg4[%c0_3, %c0_4] : memref<1x64xf32, #tpu.memory_space<vmem>>, vector<1x64xf32>
    %4 = vector.broadcast %3 : vector<1x64xf32> to vector<16x64xf32>
    %5 = arith.addf %2, %4 : vector<16x64xf32>
    %c0_5 = arith.constant 0 : index
    %c0_6 = arith.constant 0 : index
    %6 = vector.load %arg1[%c0_5, %c0_6] : memref<16x112xf32, #tpu.memory_space<vmem>>, vector<16x112xf32>
    %c0_7 = arith.constant 0 : index
    %c0_8 = arith.constant 0 : index
    %7 = vector.load %arg3[%c0_7, %c0_8] : memref<112x64xf32, #tpu.memory_space<vmem>>, vector<112x64xf32>
    %cst_9 = arith.constant dense<0.000000e+00> : vector<16x64xf32>
    %8 = tpu.matmul %6, %7, %cst_9 {dimension_numbers = #tpu.dot_dimension_numbers<[1], [0], [0], [1], [0, 0, 1, 1], [], []>} : vector<16x112xf32>, vector<112x64xf32>, vector<16x64xf32> -> vector<16x64xf32>
    %c0_10 = arith.constant 0 : index
    %c0_11 = arith.constant 0 : index
    %9 = vector.load %arg5[%c0_10, %c0_11] : memref<1x64xf32, #tpu.memory_space<vmem>>, vector<1x64xf32>
    %10 = vector.broadcast %9 : vector<1x64xf32> to vector<16x64xf32>
    %11 = arith.addf %8, %10 : vector<16x64xf32>
    %12 = arith.maximumf %5, %11 : vector<16x64xf32>
    %c0_12 = arith.constant 0 : index
    %c0_13 = arith.constant 0 : index
    %13 = vector.load %arg6[%c0_12, %c0_13] : memref<64x256xf32, #tpu.memory_space<vmem>>, vector<64x256xf32>
    %cst_14 = arith.constant dense<0.000000e+00> : vector<16x256xf32>
    %14 = tpu.matmul %12, %13, %cst_14 {dimension_numbers = #tpu.dot_dimension_numbers<[1], [0], [0], [1], [0, 0, 1, 1], [], []>} : vector<16x64xf32>, vector<64x256xf32>, vector<16x256xf32> -> vector<16x256xf32>
    %c0_15 = arith.constant 0 : index
    %c0_16 = arith.constant 0 : index
    %15 = vector.load %arg7[%c0_15, %c0_16] : memref<1x256xf32, #tpu.memory_space<vmem>>, vector<1x256xf32>
    %16 = vector.broadcast %15 : vector<1x256xf32> to vector<16x256xf32>
    %17 = arith.addf %14, %16 : vector<16x256xf32>
    %c0_17 = arith.constant 0 : index
    %c0_18 = arith.constant 0 : index
    %18 = vector.load %arg8[%c0_17, %c0_18] : memref<16x256xf32, #tpu.memory_space<vmem>>, vector<16x256xf32>
    tpu.vector_store %arg8[%c0_17, %c0_18], %17 {strides = array<i32>} : memref<16x256xf32, #tpu.memory_space<vmem>>, vector<16x256xf32>,
    return
  }
  func.func @transform_0(%arg0: i32) -> (i32, i32) {
    %c0_i32 = arith.constant 0 : i32
    %c0_i32_0 = arith.constant 0 : i32
    %c0_i32_1 = arith.constant 0 : i32
    return %c0_i32, %c0_i32_0 : i32, i32
  }
  func.func @transform_1(%arg0: i32) -> (i32, i32) {
    %c0_i32 = arith.constant 0 : i32
    %c0_i32_0 = arith.constant 0 : i32
    %c0_i32_1 = arith.constant 0 : i32
    return %c0_i32, %c0_i32_0 : i32, i32
  }
  func.func @transform_2(%arg0: i32) -> (i32, i32) {
    %c0_i32 = arith.constant 0 : i32
    %c0_i32_0 = arith.constant 0 : i32
    %c0_i32_1 = arith.constant 0 : i32
    return %c0_i32, %c0_i32_0 : i32, i32
  }
  func.func @transform_3(%arg0: i32) -> (i32, i32) {
    %c0_i32 = arith.constant 0 : i32
    %c0_i32_0 = arith.constant 0 : i32
    %c0_i32_1 = arith.constant 0 : i32
    return %c0_i32, %c0_i32_0 : i32, i32
  }
  func.func @transform_4(%arg0: i32) -> (i32, i32) {
    %c0_i32 = arith.constant 0 : i32
    %c0_i32_0 = arith.constant 0 : i32
    %c0_i32_1 = arith.constant 0 : i32
    return %c0_i32, %c0_i32_0 : i32, i32
  }
  func.func @transform_5(%arg0: i32) -> (i32, i32) {
    %c0_i32 = arith.constant 0 : i32
    %c0_i32_0 = arith.constant 0 : i32
    return %c0_i32, %arg0 : i32, i32
  }
  func.func @transform_6(%arg0: i32) -> (i32, i32) {
    %c0_i32 = arith.constant 0 : i32
    %c0_i32_0 = arith.constant 0 : i32
    return %c0_i32, %arg0 : i32, i32
  }
  func.func @transform_7(%arg0: i32) -> (i32, i32) {
    %c0_i32 = arith.constant 0 : i32
    %c0_i32_0 = arith.constant 0 : i32
    return %c0_i32, %arg0 : i32, i32
  }
}

</mosaic_0001>

<bundles_post_ra>
// kernel: tpu_custom_call.1
= control target key start
LH: loop header
LB: loop body
LE: loop exit
PB: predicated region body
PF: predicated region fallthrough
CT: control target
= control target key end

     0   :  { %12 = vsyncpa [#allocation3], 0  ;;  %s1417_s0 = inlined_call_operand.vmem [shape: f32[16,112], index: 0, kind: input, shape index: {}]   ;;  %s1418_s1 = inlined_call_operand.vmem [shape: f32[112,64], index: 1, kind: input, shape index: {}]   ;;  %s1419_s2 = inlined_call_operand.vmem [shape: f32[112,64], index: 2, kind: input, shape index: {}]   ;;  %s1420_s3 = inlined_call_operand.vmem [shape: f32[1,64], index: 3, kind: input, shape index: {}]   ;;  %s1421_s4 = inlined_call_operand.vmem [shape: f32[1,64], index: 4, kind: input, shape index: {}]   ;;  %s1422_s5 = inlined_call_operand.hbm [shape: f32[64,1024], index: 5, kind: input, shape index: {}]   ;;  %s1423_s6 = inlined_call_operand.vmem [shape: f32[1,1024], index: 6, kind: input, shape index: {}]   ;;  %s1424_s7 = inlined_call_operand.hbm [shape: f32[16,1024], index: 7, kind: output, shape index: {}]  }
   0x1   :  { %14 = vsyncpa [#allocation3 + $0x1], 0 }
   0x2   :  { %15 = vsyncpa [#allocation4], 0 }
   0x3   :  { %17 = vsyncpa [#allocation4 + $0x1], 0  ;;  %s1132_s24 = smov 0   ;;  %s1134_s25 = smov 0  }
   0x4   :  { %s1136_s26 = smov 0   ;;  %s1138_s27 = smov 0  }
   0x5 LB: > { %s1153_s28 = sadd.s32 4294967295, %s1081_s27   ;;  %s733_s29 = sadd.s32 4294967294, %s1081_s27   ;;  %s1081_s27 = sphi %s1138_s27, %s1437_s27   ;;  %s1077_s26 = sphi %s1136_s26, %s1436_s26   ;;  %s1073_s25 = sphi %s1134_s25, %s1435_s25   ;;  %s1069_s24 = sphi %s1132_s24, %s1434_s24  }
   0x6   : > { %s1157_s30 = sadd.s32 1, %s1081_s27   ;;  %s135_s8 = sadd.s32 1, %s1077_s26 }
   0x7   : > { %s132_s9 = ssub.s32 %s1081_s27, %s1157_s30  ;;  %p142_p0 = scmp.ne.s32.totalorder %s1077_s26, %s1073_s25 }
   0x8   : > { %p133_p1 = scmp.eq.s32.totalorder %s132_s9, 0  ;;  %p143_p2 = scmp.eq.s32.totalorder %s1081_s27, 0 }
   0x9   : > { %p148_p3 = scmp.ne.s32.totalorder %s1073_s25, %s1069_s24  ;;  %p149_p4 = scmp.eq.s32.totalorder %s1153_s28, 0 }
   0xa   : > { %s1169_s10 = scalar_select %p133_p1, %s1077_s26, %s135_s8  }
   0xb   : > { %p1171_p5 = por %p143_p2, %p142_p0  ;;  %p1175_p6 = por %p149_p4, %p148_p3 }
   0xc   : > { %p198_p7 = scmp.eq.s32.totalorder %s1153_s28, 3  ;;  %p204_p8 = scmp.eq.s32.totalorder %s733_s29, 3 }
   0xd   : > { %p944_p9 = scmp.lt.s32.totalorder %s1081_s27, 4  ;;  %s239_s15 = sand.u32 1, %s1077_s26  }
   0xe   : > { %p1181_p10 = por %p198_p7, %p142_p0  ;;  %p1185_p11 = por %p204_p8, %p148_p3 }
   0xf   : > { %s756_s16 = sshll.u32 %s1081_s27, 8  ;;  %s736_s17 = sshll.u32 %s239_s15, 7 }
  0x10   : > { %s1428_s13 = scalar_select %p1181_p10, 1, 0 }
  0x11   : > { %s1429_s14 = scalar_select %p1185_p11, 1, 0 }
  0x12   : > { %s1194_s20 = scalar_lea.hbm %s1422_s5, %s756_s16  ;;  %s243_s21 = scalar_lea.vmem [#allocation2], %s736_s17 }
  0x13   : > { %s250_s22 = sshll.u32 %s243_s21, 4  ;;  %p1198_p12 = pnand %p944_p9, %p1171_p5  ;;  %s1202_s22 = int_to_ptr.vmem [resolvable:$true] %s250_s22 }
  0x14   : > { %s1205_s29 = scalar_lea.sflag [#allocation3], %s239_s15  ;;  %s985_s8 = scalar_lea.hbm %s1194_s20, 2048 }
  0x15   : > { %p986_p0 = scmp.ne.s32.totalorder %s1194_s20, %s985_s8  ;;  %p987_p1 = pneg %p1198_p12 }
  0x16   : > { %s990_s16 = scalar_lea.hbm %s1422_s5, 8192  ;;  %p991_p4 = scmp.lt.u32.totalorder %s1194_s20, %s1422_s5 }
  0x17   : > { %p988_p2 = pnand %p987_p1, %p986_p0  ;;  %p992_p5 = scmp.lt.u32.totalorder %s990_s16, %s985_s8 }
  0x18   : > { %p994_p8 = scmp.lt.u32.totalorder %s985_s8, %s1194_s20 }
  0x19   : > { %p989_p3 = pneg %p988_p2  ;;  %p993_p7 = por %p992_p5, %p991_p4 }
  0x1b   : > { %p995_p9 = por %p994_p8, %p993_p7 }
  0x1d   : > { %p996_p13 = pnand %p995_p9, %p989_p3 }
  0x1f   : > { %999 = shalt.err (!%p996_p13)
}
  0x20   : > { %s1000_s15 = scalar_lea.vmem %s1202_s22, 2048  ;;  %s1083_s19 = smov [#allocation2]  }
  0x21   : > { %p1001_p0 = scmp.ne.s32.totalorder %s1202_s22, %s1000_s15  ;;  %s1005_s21 = sshll.u32 %s1083_s19, 4  ;;  %s1006_s21 = int_to_ptr.vmem [resolvable:$false] %s1005_s21 }
  0x22   : > { %s1007_s9 = scalar_lea.vmem %s1006_s21, 4096  ;;  %p1008_p10 = scmp.lt.s32.totalorder %s1202_s22, %s1006_s21 }
  0x23   : > { %p1003_p2 = pnand %p1001_p0, %p987_p1  ;;  %p1009_p4 = scmp.lt.s32.totalorder %s1007_s9, %s1000_s15 }
  0x25   : > { %p1004_p11 = pneg %p1003_p2  ;;  %p1010_p5 = por %p1009_p4, %p1008_p10 }
  0x27   : > { %p1011_p7 = pnand %p1010_p5, %p1004_p11 }
  0x29   : > { %1014 = shalt.err (!%p1011_p7)
}
  0x2a   : > { %s1084_s8 = smov 1024   ;;  %s1085_s11 = smov 256  }
  0x2b   : > { %s1086_s16 = smov 16   ;;  %p266_p13 = scmp.lt.s32.totalorder %s1081_s27, 5 }
  0x2c   : > { %939 = dma.hbm_to_vmem [thread:$0]  (!%p1198_p12), %s1194_s20, 2048, %s1202_s22, %s1205_s29, %s1084_s8, %s1085_s11, %s1086_s16  }
  0x2d   : > { %p1431_p1 = scmp.ge.s32.totalorder %s1081_s27, 1 }
  0x2f   : > { %p267_p3 = pnand %p1431_p1, %p266_p13 }
  0x30   : > { %s1237_s17 = sand.u32 (!%p267_p3), 1, %s1073_s25  }
  0x31   : > { %270 = sbr.rel (%p267_p3) target bundleno = 537 (0x219), region = 48  ;;  %s740_s18 = sshll.u32 (!%p267_p3), %s1237_s17, 7 }
  0x32   : > { %s273_s15 = scalar_lea.sflag (!%p267_p3), [#allocation3], %s1237_s17  ;;  %s1241_s19 = scalar_lea.vmem (!%p267_p3), [#allocation2], %s740_s18 }
  0x38   : > { %1060 = dma.done.wait (%p1175_p6), %s273_s15, 2048  }
  0x39   : > { %1062 = vsyncadd (%p1175_p6), %s273_s15, 4294965248  ;;  %v320_v0 = vld [vmem:[%s1418_s1] sm:$0xff]  ;;  %v321_v1 = vld [vmem:[%s1418_s1 + $0x8] sm:$0xff]  ;;  %vm341_vm0 = vcmask 916480   ;;  %vm549_vm1 = vcmask 523264   ;;  %s741_s11 = sshll.u32 %s1237_s17, 5 }
  0x3a   : > { %v423_v2 = vld [vmem:[%s1419_s2] sm:$0xff]  ;;  %v852_v3 = vpack.c.bf16 %v321_v1, %v320_v0  ;;  %v424_v4 = vld [vmem:[%s1419_s2 + $0x8] sm:$0xff]  ;;  %v322_v5 = vld [vmem:[%s1418_s1 + $0x10] sm:$0xff]  ;;  %s310_s16 = scalar_lea.vmem [#allocation5], %s741_s11  ;;  %s757_s18 = sshll.u32 %s1153_s28, 8 }
  0x3b   : > { %v323_v6 = vld [vmem:[%s1418_s1 + $0x18] sm:$0xff]  ;;  %v880_v7 = vpack.c.bf16 %v424_v4, %v423_v2  ;;  %v425_v9 = vld [vmem:[%s1419_s2 + $0x10] sm:$0xff]  ;;  %v324_v11 = vld [vmem:[%s1418_s1 + $0x20] sm:$0xff]  ;;  %v1087_v4 = vmov 0.0   ;;  %s651_s12 = sshll.u32 %s310_s16, 4  ;;  %s1374_s22 = scalar_lea.hbm %s1424_s7, %s757_s18  ;;  %s1369_s12 = int_to_ptr.vmem [resolvable:$true] %s651_s12 }
  0x3c   : > { %v856_v8 = vpack.c.bf16 %v323_v6, %v322_v5  ;;  %v426_v10 = vld [vmem:[%s1419_s2 + $0x18] sm:$0xff]  ;;  %853 = vmatprep.subr.bf16.mxu0 %v852_v3  ;;  %v325_v13 = vld [vmem:[%s1418_s1 + $0x28] sm:$0xff]  ;;  %v427_v14 = vld [vmem:[%s1419_s2 + $0x20] sm:$0xff]  ;;  %s1015_s23 = scalar_lea.vmem %s1369_s12, 512  ;;  %p1432_p11 = scmp.ne.s32.totalorder %s1428_s13, 0 }
  0x3d   : > { %v884_v12 = vpack.c.bf16 %v426_v10, %v425_v9  ;;  %v428_v15 = vld [vmem:[%s1419_s2 + $0x28] sm:$0xff]  ;;  %881 = vmatprep.subr.bf16.mxu1 %v880_v7  ;;  %855 = vmatpush3.bf16.msra.mxu0 %v852_v3  ;;  %v860_v16 = vpack.c.bf16 %v325_v13, %v324_v11  ;;  %v326_v18 = vld [vmem:[%s1418_s1 + $0x30] sm:$0xff]  ;;  %v327_v19 = vld [vmem:[%s1418_s1 + $0x38] sm:$0xff]  ;;  %p1016_p10 = scmp.ne.s32.totalorder %s1369_s12, %s1015_s23  ;;  %s1088_s29 = smov [#allocation5]  }
  0x3e   : > { %883 = vmatpush3.bf16.msra.mxu1 %v880_v7  ;;  %857 = vmatprep.subr.bf16.mxu0 %v856_v8  ;;  %v888_v17 = vpack.c.bf16 %v428_v15, %v427_v14  ;;  %v429_v20 = vld [vmem:[%s1419_s2 + $0x30] sm:$0xff]  ;;  %v430_v21 = vld [vmem:[%s1419_s2 + $0x38] sm:$0xff]  ;;  %v864_v22 = vpack.c.bf16 %v327_v19, %v326_v18  ;;  %v318_v23 = vld [vmem:[%s1417_s0] sm:$0xff] }
  0x3f   : > { %885 = vmatprep.subr.bf16.mxu1 %v884_v12  ;;  %v892_v24 = vpack.c.bf16 %v430_v21, %v429_v20  ;;  %v328_v25 = vld [vmem:[%s1418_s1 + $0x40] sm:$0xff]  ;;  %v329_v26 = vld [vmem:[%s1418_s1 + $0x48] sm:$0xff]  ;;  %818 = vmatprep.mubr.msk.f32.mxu0 %vm341_vm0, %v318_v23  ;;  %v330_v31 = vld [vmem:[%s1418_s1 + $0x50] sm:$0xff]  ;;  %p1017_p12 = pnand %p1016_p10, %p1432_p11 }
  0x40   : > { %v431_v27 = vld [vmem:[%s1419_s2 + $0x40] sm:$0xff]  ;;  %v432_v28 = vld [vmem:[%s1419_s2 + $0x48] sm:$0xff]  ;;  %849 = vmatprep.mubr.msk.f32.mxu1 %vm341_vm0, %v318_v23  ;;  %v868_v29 = vpack.c.bf16 %v329_v26, %v328_v25  ;;  %v331_v32 = vld [vmem:[%s1418_s1 + $0x58] sm:$0xff] }
  0x41   : > { %859 = vmatpush3.bf16.msra.mxu0 %v856_v8  ;;  %v896_v30 = vpack.c.bf16 %v432_v28, %v431_v27  ;;  %v433_v33 = vld [vmem:[%s1419_s2 + $0x50] sm:$0xff]  ;;  %v434_v34 = vld [vmem:[%s1419_s2 + $0x58] sm:$0xff]  ;;  %v872_v35 = vpack.c.bf16 %v331_v32, %v330_v31  ;;  %v332_v37 = vld [vmem:[%s1418_s1 + $0x60] sm:$0xff]  ;;  %p1018_p8 = pneg %p1017_p12 }
  0x42   : > { %887 = vmatpush3.bf16.msra.mxu1 %v884_v12  ;;  %861 = vmatprep.subr.bf16.mxu0 %v860_v16  ;;  %v900_v36 = vpack.c.bf16 %v434_v34, %v433_v33  ;;  %v333_v38 = vld [vmem:[%s1418_s1 + $0x68] sm:$0xff]  ;;  %v435_v39 = vld [vmem:[%s1419_s2 + $0x60] sm:$0xff]  ;;  %v524_v44 = vld [vmem:[%s1241_s19 + $0x18] sm:$0xff] }
  0x43   : > { %889 = vmatprep.subr.bf16.mxu1 %v888_v17  ;;  %v436_v40 = vld [vmem:[%s1419_s2 + $0x68] sm:$0xff]  ;;  %v876_v41 = vpack.c.bf16 %v333_v38, %v332_v37  ;;  %v521_v46 = vld [vmem:[%s1241_s19] sm:$0xff]  ;;  %v523_v47 = vld [vmem:[%s1241_s19 + $0x10] sm:$0xff] }
  0x44   : > { %v904_v42 = vpack.c.bf16 %v436_v40, %v435_v39  ;;  %v522_v43 = vld [vmem:[%s1241_s19 + $0x8] sm:$0xff]  ;;  %v528_v49 = vld [vmem:[%s1241_s19 + $0x38] sm:$0xff]  ;;  %v910_v51 = vpack.c.bf16 %v523_v47, %v521_v46  ;;  %v525_v53 = vld [vmem:[%s1241_s19 + $0x20] sm:$0xff] }
  0x45   : > { %863 = vmatpush3.bf16.msra.mxu0 %v860_v16  ;;  %v908_v45 = vpack.c.bf16 %v524_v44, %v522_v43  ;;  %v526_v48 = vld [vmem:[%s1241_s19 + $0x28] sm:$0xff]  ;;  %v527_v54 = vld [vmem:[%s1241_s19 + $0x30] sm:$0xff]  ;;  %v532_v56 = vld [vmem:[%s1241_s19 + $0x58] sm:$0xff] }
  0x46   : > { %891 = vmatpush3.bf16.msra.mxu1 %v888_v17  ;;  %865 = vmatprep.subr.bf16.mxu0 %v864_v22  ;;  %v319_v50 = vld [vmem:[%s1417_s0 + $0x8] sm:$0xff]  ;;  %v912_v52 = vpack.c.bf16 %v528_v49, %v526_v48  ;;  %v914_v57 = vpack.c.bf16 %v527_v54, %v525_v53  ;;  %v529_v59 = vld [vmem:[%s1241_s19 + $0x40] sm:$0xff]  ;;  %v531_v60 = vld [vmem:[%s1241_s19 + $0x50] sm:$0xff]  ;;  %v539_v17 = vlaneseq }
  0x47   : > { %893 = vmatprep.subr.bf16.mxu1 %v892_v24  ;;  %v530_v55 = vld [vmem:[%s1241_s19 + $0x48] sm:$0xff]  ;;  %v918_v61 = vpack.c.bf16 %v531_v60, %v529_v59  ;;  %v536_v63 = vld [vmem:[%s1241_s19 + $0x78] sm:$0xff]  ;;  %v533_v1 = vld [vmem:[%s1241_s19 + $0x60] sm:$0xff] }
  0x48   : > { %v916_v58 = vpack.c.bf16 %v532_v56, %v530_v55  ;;  %v534_v62 = vld [vmem:[%s1241_s19 + $0x68] sm:$0xff]  ;;  %v535_v2 = vld [vmem:[%s1241_s19 + $0x70] sm:$0xff]  ;;  %v743_v5 = vld [vmem:[%s1420_s3] ss:$0 sm:$0xff]  ;;  %s742_s19 = sshll.u32 %s1153_s28, 1  ;;  %v540_v18 = vshrl.u32 %v539_v17, 7 }
  0x49   : > { %867 = vmatpush3.bf16.msra.mxu0 %v864_v22  ;;  %v920_v0 = vpack.c.bf16 %v536_v63, %v534_v62  ;;  %v922_v3 = vpack.c.bf16 %v535_v2, %v533_v1  ;;  %v746_v6 = vld [vmem:[%s1421_s4] ss:$0 sm:$0xff]  ;;  %p313_p6 = scmp.lt.s32.totalorder %s742_s19, 7  ;;  %s638_s28 = scalar_lea.sflag [#allocation4], %s1237_s17 }
  0x4a   : > { %895 = vmatpush3.bf16.msra.mxu1 %v892_v24  ;;  %869 = vmatprep.subr.bf16.mxu0 %v868_v29  ;;  %v541_v19 = vsub.s32 0, %v540_v18  ;;  %v545_v21 = vsub.s32 1, %v540_v18 }
  0x4b   : > { %897 = vmatprep.subr.bf16.mxu1 %v896_v30  ;;  %s1439_s19 = smov (!%p313_p6, %s742_s19), 7 }
  0x4c   : > { %s315_s8 = scalar_lea.vmem %s1423_s6, %s1439_s19  ;;  %s1019_s19 = sshll.u32 %s1088_s29, 4  ;;  %s1020_s19 = int_to_ptr.vmem [resolvable:$false] %s1019_s19 }
  0x4d   : > { %871 = vmatpush3.bf16.msra.mxu0 %v868_v29  ;;  %v537_v20 = vld [vmem:[%s315_s8] sm:$0x3]  ;;  %s1021_s21 = scalar_lea.vmem %s1020_s19, 1024  ;;  %p1022_p9 = scmp.lt.s32.totalorder %s1369_s12, %s1020_s19 }
  0x4e   : > { %899 = vmatpush3.bf16.msra.mxu1 %v896_v30  ;;  %873 = vmatprep.subr.bf16.mxu0 %v872_v35  ;;  %v542_v22 = vrot.slane %v537_v20, %v541_v19  ;;  %v546_v23 = vrot.slane %v537_v20, %v545_v21  ;;  %p1023_p0 = scmp.lt.s32.totalorder %s1021_s21, %s1015_s23 }
  0x4f   : > { %901 = vmatprep.subr.bf16.mxu1 %v900_v36 }
  0x50   : > { %p1024_p2 = por %p1023_p0, %p1022_p9 }
  0x51   : > { %875 = vmatpush3.bf16.msra.mxu0 %v872_v35 }
  0x52   : > { %903 = vmatpush3.bf16.msra.mxu1 %v900_v36  ;;  %877 = vmatprep.subr.bf16.mxu0 %v876_v41  ;;  %p1025_p4 = pnand %p1024_p2, %p1018_p8 }
  0x53   : > { %905 = vmatprep.subr.bf16.mxu1 %v904_v42 }
  0x55   : > { %879 = vmatpush3.bf16.msra.mxu0 %v876_v41 }
  0x56   : > { %907 = vmatpush3.bf16.msra.mxu1 %v904_v42  ;;  %909 = vmatprep.subr.bf16.mxu0 %v908_v45 }
  0x57   : > { %924 = vmatprep.subr.bf16.mxu1 %v908_v45 }
  0x58   : > { %819 = vmatmul.mubr.msk.f32.vlgmr.msra.gmra.mrb[0].mxu0 %vm341_vm0, %v319_v50 }
  0x59   : > { %850 = vmatmul.mubr.msk.f32.vlgmr.msra.gmra.mrb[0].mxu1 %vm341_vm0, %v319_v50  ;;  %911 = vmatpush1.bf16.msra.mxu0 %v910_v51 }
  0x5a   : > { %928 = vmatpush1.bf16.msra.mxu1 %v910_v51  ;;  %913 = vmatprep.subr.bf16.mxu0 %v912_v52 }
  0x5b   : > { %925 = vmatprep.subr.bf16.mxu1 %v912_v52  ;;  %626 = vmatprep.mubr.f32.mxu1 %v1087_v4 }
  0x5c   : > { %620 = vmatprep.mubr.f32.mxu0 %v1087_v4 }
  0x5d   : > { %915 = vmatpush1.bf16.msra.mxu0 %v914_v57 }
  0x5e   : > { %929 = vmatpush1.bf16.msra.mxu1 %v914_v57  ;;  %917 = vmatprep.subr.bf16.mxu0 %v916_v58 }
  0x5f   : > { %926 = vmatprep.subr.bf16.mxu1 %v916_v58 }
  0x61   : > { %919 = vmatpush1.bf16.msra.mxu0 %v918_v61 }
  0x62   : > { %930 = vmatpush1.bf16.msra.mxu1 %v918_v61  ;;  %921 = vmatprep.subr.bf16.mxu0 %v920_v0 }
  0x63   : > { %927 = vmatprep.subr.bf16.mxu1 %v920_v0 }
  0x65   : > { %923 = vmatpush1.bf16.msra.mxu0 %v922_v3 }
  0x66   : > { %931 = vmatpush1.bf16.msra.mxu1 %v922_v3 }
 0x12b   : > { %v820_v7 = vpop.f32.mrb[0].mxu0 }
 0x12c   : > { %v420_v8 = vadd.f32 %v820_v7, %v743_v5  ;;  %v851_v9 = vpop.f32.mrb[0].mxu1  ;;  %v414_v10 = vpop.f32.mrb[1].mxu0 }
 0x12d   : > { %v516_v11 = vadd.f32 %v851_v9, %v746_v6  ;;  %v415_v12 = vadd.f32 %v743_v5, %v414_v10  ;;  %v510_v13 = vpop.f32.mrb[1].mxu1 }
 0x12e   : > { %v511_v14 = vadd.f32 %v746_v6, %v510_v13 }
 0x12f   : > { %v520_v15 = vmax.f32 %v420_v8, %v516_v11 }
 0x130   : > { %v519_v16 = vmax.f32 %v415_v12, %v511_v14 }
 0x131   : > { %750 = vmatmul.mubr.msk.f32.vlgmr.msra.gmra.mrb[2].mxu1 %vm549_vm1, %v520_v15 }
 0x132   : > { %749 = vmatmul.mubr.msk.f32.vlgmr.msra.gmra.mrb[2].mxu0 %vm549_vm1, %v519_v16 }
 0x204   : > { %v628_v24 = vpop.f32.mrb[2].mxu1 }
 0x205   : > { %v629_v25 = vadd.f32 %v628_v24, %v542_v22  ;;  %v622_v26 = vpop.f32.mrb[2].mxu0  ;;  %v630_v27 = vpop.f32.mrb[3].mxu1 }
 0x206   : > { %v623_v28 = vadd.f32 %v622_v26, %v542_v22  ;;  %v631_v29 = vadd.f32 %v630_v27, %v546_v23  ;;  %v624_v30 = vpop.f32.mrb[3].mxu0 }
 0x207   : > { %635 = vst [vmem:[%s310_s16 + $0x10] sm:$0xff] %v629_v25  ;;  %v625_v31 = vadd.f32 %v624_v30, %v546_v23 }
 0x208   : > { %633 = vst [vmem:[%s310_s16] sm:$0xff] %v623_v28  ;;  %636 = vst [vmem:[%s310_s16 + $0x18] sm:$0xff] %v631_v29 }
 0x209   : > { %634 = vst [vmem:[%s310_s16 + $0x8] sm:$0xff] %v625_v31 }
 0x20a   : > { %1028 = shalt.err (!%p1025_p4)
}
 0x20b   : > { %s1029_s9 = scalar_lea.hbm %s1374_s22, 512  ;;  %s1033_s16 = scalar_lea.hbm %s1424_s7, 2048 }
 0x20c   : > { %p1030_p5 = scmp.ne.s32.totalorder %s1374_s22, %s1029_s9  ;;  %p1034_p1 = scmp.lt.u32.totalorder %s1374_s22, %s1424_s7 }
 0x20d   : > { %p1035_p3 = scmp.lt.u32.totalorder %s1033_s16, %s1029_s9  ;;  %p1037_p10 = scmp.lt.u32.totalorder %s1029_s9, %s1374_s22 }
 0x20e   : > { %p1031_p7 = pnand %p1030_p5, %p1432_p11 }
 0x20f   : > { %p1036_p6 = por %p1035_p3, %p1034_p1 }
 0x210   : > { %p1032_p13 = pneg %p1031_p7 }
 0x211   : > { %p1038_p12 = por %p1037_p10, %p1036_p6 }
 0x213   : > { %p1039_p8 = pnand %p1038_p12, %p1032_p13 }
 0x215   : > { %1042 = shalt.err (!%p1039_p8)
}
 0x216   : > { %s1089_s20 = smov 256   ;;  %s1090_s23 = smov 1024  }
 0x217   : > { %s1091_s29 = smov 16  }
 0x218   : > { %934 = dma.vmem_to_hbm [thread:$0]  (%p1432_p11), %s1369_s12, 512, %s1374_s22, %s638_s28, %s1089_s20, %s1090_s23, %s1091_s29  }
 0x219 PF: > { %p945_p9 = scmp.ge.s32.totalorder %s1081_s27, 2  ;;  %s666_s19 = sand.u32 1, %s1069_s24  }
 0x21a   : > { %p1433_p0 = scmp.ne.s32.totalorder %s1429_s14, 0  ;;  %s667_s21 = scalar_lea.sflag [#allocation4], %s666_s19 }
 0x21c   : > { %p941_p2 = pnand %p945_p9, %p1433_p0 }
 0x21e   : > { %1064 = dma.done.wait (!%p941_p2), %s667_s21, 512  }
 0x21f   : > { %1066 = vsyncadd (!%p941_p2), %s667_s21, 4294966784  ;;  %p20_p4 = scmp.ge.s32.totalorder %s1157_s30, 6   ;;  %s1434_s24 = smov %s1073_s25 }
 0x220   : > { %s1435_s25 = smov %s1077_s26  ;;  %s1436_s26 = smov %s1169_s10 }
 0x221   : > { %s1437_s27 = smov %s1157_s30  ;;  %22 = sbr.rel (!%p20_p4) target bundleno = 5 (0x5), region = 96 }
 0x228   :  { %672 = vsyncpa [#allocation3], 1 }
 0x229   :  { %674 = vsyncpa [#allocation3 + $0x1], 1 }
 0x22a   :  { %675 = vsyncpa [#allocation4], 1 }
 0x22b   :  { %677 = vsyncpa [#allocation4 + $0x1], 1 }

</bundles_post_ra>
